<compile_context>
chip_gen: v5e
topology: v5e:2x2
jax: 0.10.0
libtpu: 0.0.40
codegen_flags: <defaults>
</compile_context>

<pallas_src>
import jax
import jax.numpy as jnp
from jax.experimental import pallas as pl
from jax.experimental.pallas import tpu as pltpu


def _round_up(a, m):
    return (a + m - 1) // m * m


# ------------------------------------------------------------------
# Pallas kernels
# ------------------------------------------------------------------
def _make_conv_kernel(G, Wp, L, Cin, apply_input_bn, compute_dtype):
    """Fused 3x3 conv over one image slab in channel-major layout.

    Input slab:  (Cin, S)  -- zero-padded image, flattened (Hp*Wp) on lanes,
                              with >= Wp+1 zero guard lanes on each side.
    Output:      (Cout, S) -- same layout (directly consumable by the next
                              conv), plus per-image BN partial sums.
    """
    tap_offsets = [G + (di - 1) * Wp + (dj - 1)
                   for di in range(3) for dj in range(3)]

    def kernel(*refs):
        if apply_input_bn:
            (x_ref, w_ref, imask_ref, smask_ref, scale_ref, shift_ref,
             y_ref, sum_ref, ssq_ref, xcat_ref) = refs
        else:
            (x_ref, w_ref, imask_ref,
             y_ref, sum_ref, ssq_ref, xcat_ref) = refs

        slab = x_ref[0]                                   # (Cin, S) f32
        if apply_input_bn:
            # Fused BatchNorm1 (scale/shift) + ReLU on the *input* activation.
            # smask zeroes the conv's zero-padding ring and the guard lanes
            # (relu(0*s + b) would otherwise leak a nonzero pad value).
            slab = jnp.maximum(slab * scale_ref[...] + shift_ref[...], 0.0)
            slab = slab * smask_ref[...]
        slab = slab.astype(compute_dtype)

        # Build the im2col tile for this image in VMEM: sublane-block p holds
        # the Cin channels of tap p (a lane-shifted view of the slab).
        for p, off in enumerate(tap_offsets):
            xcat_ref[p * Cin:(p + 1) * Cin, :] = slab[:, off:off + L]

        # Single MXU matmul: the 9 taps are folded into the contraction dim.
        y = jnp.dot(w_ref[...], xcat_ref[...],
                    preferred_element_type=jnp.float32)    # (Cout, L)
        y = y * imask_ref[...]                             # zero padding ring

        # Per-image BatchNorm partial statistics (masked positions add 0).
        sum_ref[0] = jnp.sum(y, axis=1, keepdims=True)      # (Cout, 1)
        ssq_ref[0] = jnp.sum(y * y, axis=1, keepdims=True)  # (Cout, 1)

        # Store in the same guarded padded layout.  Guards / ring must be
        # zero: the next conv reads them.  First store is a full unmasked
        # lane-dense vst (S is a multiple of 128); second is a lane-aligned
        # partial store of the interior window.
        _, cout, s = y_ref.shape
        y_ref[0] = jnp.zeros((cout, s), dtype=jnp.float32)
        y_ref[0, :, G:G + L] = y

    return kernel


def _bn_add_relu_kernel(y_ref, r_ref, scale_ref, shift_ref, o_ref):
    # BN2 (folded scale/shift) + identity shortcut + ReLU, all f32 on the VPU.
    o_ref[0] = jnp.maximum(
        y_ref[0] * scale_ref[...] + shift_ref[...] + r_ref[0], 0.0)


# ------------------------------------------------------------------
# pallas_call wrappers
# ------------------------------------------------------------------
def fused_conv3x3(x_flat, w_t, imask, smask, scale, shift, *,
                  H, W, G, apply_input_bn, compute_dtype=jnp.float32):
    """x_flat: (N, Cin, S) guarded padded slabs.  w_t: (Cout, 9*Cin).

    Returns (y, sum, sumsq): y in the same (N, Cout, S) layout, plus
    per-image per-channel partial sums for the following BatchNorm.
    """
    N, Cin, S = x_flat.shape
    Cout = w_t.shape[0]
    Hp, Wp = H + 2, W + 2
    L = Hp * Wp

    inputs = [x_flat, w_t.astype(compute_dtype), imask]
    in_specs = [
        pl.BlockSpec((1, Cin, S), lambda n: (n, 0, 0)),     # per-image slab
        pl.BlockSpec((Cout, 9 * Cin), lambda n: (0, 0)),    # resident weights
        pl.BlockSpec((1, L), lambda n: (0, 0)),             # resident mask
    ]
    if apply_input_bn:
        inputs += [smask, scale, shift]
        in_specs += [
            pl.BlockSpec((1, S), lambda n: (0, 0)),
            pl.BlockSpec((Cin, 1), lambda n: (0, 0)),
            pl.BlockSpec((Cin, 1), lambda n: (0, 0)),
        ]

    out_shape = (
        jax.ShapeDtypeStruct((N, Cout, S), jnp.float32),
        jax.ShapeDtypeStruct((N, Cout, 1), jnp.float32),
        jax.ShapeDtypeStruct((N, Cout, 1), jnp.float32),
    )
    out_specs = [
        pl.BlockSpec((1, Cout, S), lambda n: (n, 0, 0)),
        pl.BlockSpec((1, Cout, 1), lambda n: (n, 0, 0)),
        pl.BlockSpec((1, Cout, 1), lambda n: (n, 0, 0)),
    ]

    kernel = _make_conv_kernel(G, Wp, L, Cin, apply_input_bn, compute_dtype)
    return pl.pallas_call(
        kernel,
        out_shape=out_shape,
        grid_spec=pltpu.PrefetchScalarGridSpec(
            num_scalar_prefetch=0,
            grid=(N,),                                   # >= 2 tiles: both TCs
            in_specs=in_specs,
            out_specs=out_specs,
            scratch_shapes=[pltpu.VMEM((9 * Cin, L), compute_dtype)],
        ),
        compiler_params=pltpu.CompilerParams(
            dimension_semantics=("parallel",)),
    )(*inputs)


def bn_add_relu(y, res, scale, shift):
    """Elementwise BN2 + residual add + ReLU in the padded (N, C, S) layout."""
    N, C, S = y.shape
    return pl.pallas_call(
        _bn_add_relu_kernel,
        out_shape=jax.ShapeDtypeStruct((N, C, S), jnp.float32),
        grid_spec=pltpu.PrefetchScalarGridSpec(
            num_scalar_prefetch=0,
            grid=(N,),
            in_specs=[
                pl.BlockSpec((1, C, S), lambda n: (n, 0, 0)),
                pl.BlockSpec((1, C, S), lambda n: (n, 0, 0)),
                pl.BlockSpec((C, 1), lambda n: (0, 0)),
                pl.BlockSpec((C, 1), lambda n: (0, 0)),
            ],
            out_specs=pl.BlockSpec((1, C, S), lambda n: (n, 0, 0)),
        ),
        compiler_params=pltpu.CompilerParams(
            dimension_semantics=("parallel",)),
    )(y, res, scale, shift)


# ------------------------------------------------------------------
# JAX glue: parameters, BN folding, layout plumbing
# ------------------------------------------------------------------
def init_params(key, in_planes, planes, rank, stride=1):
    ks = jax.random.split(key, 4)
    return {
        "stride": stride,
        # conv1: 9 taps, each W[:, :, i, j] = U1[3i+j] @ V1[3i+j]
        "U1": 0.1 * jax.random.normal(ks[0], (9, planes, rank), jnp.float32),
        "V1": 0.1 * jax.random.normal(ks[1], (9, rank, in_planes), jnp.float32),
        # conv2
        "U2": 0.1 * jax.random.normal(ks[2], (9, planes, rank), jnp.float32),
        "V2": 0.1 * jax.random.normal(ks[3], (9, rank, planes), jnp.float32),
        # BatchNorm affine params (PyTorch default init: gamma=1, beta=0)
        "gamma1": jnp.ones((planes,), jnp.float32),
        "beta1": jnp.zeros((planes,), jnp.float32),
        "gamma2": jnp.ones((planes,), jnp.float32),
        "beta2": jnp.zeros((planes,), jnp.float32),
    }


def _dense_taps(U, V):
    """W_dense[p] = U[p] @ V[p]  -> (9, Cout, Cin), then (Cout, 9*Cin)."""
    hp = jax.lax.Precision.HIGHEST
    wd = jnp.einsum("por,prc->poc", U, V, precision=hp)        # (9, Cout, Cin)
    cout, cin = wd.shape[1], wd.shape[2]
    return jnp.transpose(wd, (1, 0, 2)).reshape(cout, 9 * cin)


def _fold_bn(sum_, ssq, gamma, beta, count, eps=1e-5):
    """Train-mode BatchNorm2d (biased variance) folded into scale/shift."""
    total = jnp.sum(sum_, axis=0)[:, 0]       # (C,)
    total_sq = jnp.sum(ssq, axis=0)[:, 0]
    mean = total / count
    var = total_sq / count - mean * mean
    scale = gamma / jnp.sqrt(var + eps)
    shift = beta - mean * scale
    return scale, shift


def basic_block_forward(x_nchw, params, compute_dtype=jnp.float32):
    stride = params["stride"]
    x = x_nchw.astype(jnp.float32)
    N, Cin, H, W = x.shape
    Cout = params["U1"].shape[1]
    if stride != 1 or Cin != Cout:
        # TODO(synk): strided conv1 + option 'A'/'B' downsampling shortcuts
        # (not exercised by this configuration; identity shortcut only).
        raise NotImplementedError(
            "only stride=1 with in_planes == planes (identity shortcut)")

    Hp, Wp = H + 2, W + 2
    L = Hp * Wp
    G = _round_up(Wp + 1, 128)          # lane-aligned leading guard >= Wp+1
    # Tail guard >= Wp+1, chosen so the total slab width S is a multiple of
    # 128: full-slab stores become unmasked lane-dense vst.
    S = _round_up(G + L + Wp + 1, 128)

    # Channel-major guarded padded layout (N, C, S): no NCHW<->NHWC transpose.
    x_pad = jnp.pad(x, ((0, 0), (0, 0), (1, 1), (1, 1))).reshape(N, Cin, L)
    x_flat = jnp.pad(x_pad, ((0, 0), (0, 0), (G, S - G - L)))

    # Dense per-tap weights with the 9 taps folded into the contraction dim.
    w1t = _dense_taps(params["U1"], params["V1"])    # (Cout, 9*Cin)
    w2t = _dense_taps(params["U2"], params["V2"])    # (Cout, 9*Cout)

    # Interior mask: 1 at valid output pixels, 0 on the padding ring / guards.
    pidx = jnp.arange(L, dtype=jnp.int32)
    row, col = pidx // Wp, pidx % Wp
    imask = (((row >= 1) & (row <= H) & (col >= 1) & (col <= W))
             .astype(jnp.float32).reshape(1, L))
    smask = jnp.pad(imask, ((0, 0), (G, S - G - L)))

    count = float(N * H * W)

    # conv1  (+ per-image BN1 partial statistics)
    y1, sum1, ssq1 = fused_conv3x3(
        x_flat, w1t, imask, smask, None, None,
        H=H, W=W, G=G, apply_input_bn=False, compute_dtype=compute_dtype)
    s1, b1 = _fold_bn(sum1, ssq1, params["gamma1"], params["beta1"], count)

    # conv2 with BN1 + ReLU fused onto its input  (+ BN2 partial statistics)
    y2, sum2, ssq2 = fused_conv3x3(
        y1, w2t, imask, smask, s1.reshape(Cout, 1), b1.reshape(Cout, 1),
        H=H, W=W, G=G, apply_input_bn=True, compute_dtype=compute_dtype)
    s2, b2 = _fold_bn(sum2, ssq2, params["gamma2"], params["beta2"], count)

    # BN2 + identity shortcut + ReLU (elementwise, padded layout)
    out_flat = bn_add_relu(y2, x_flat,
                           s2.reshape(Cout, 1), b2.reshape(Cout, 1))

    out = (out_flat[:, :, G:G + L]
           .reshape(N, Cout, Hp, Wp)[:, :, 1:H + 1, 1:W + 1])
    return out                                                  # NCHW


# ------------------------------------------------------------------
# Pure-JAX reference (same math, no Pallas) for the correctness check
# ------------------------------------------------------------------
def reference_forward(x_nchw, params):
    x = x_nchw.astype(jnp.float32)
    hp = jax.lax.Precision.HIGHEST

    def dense_w(U, V):
        wd = jnp.einsum("por,prc->poc", U, V, precision=hp)   # (9, Cout, Cin)
        return wd.reshape(3, 3, wd.shape[1], wd.shape[2]).transpose(2, 3, 0, 1)

    def conv3x3(inp, w):
        return jax.lax.conv_general_dilated(
            inp, w, window_strides=(1, 1), padding=((1, 1), (1, 1)),
            dimension_numbers=("NCHW", "OIHW", "NCHW"), precision=hp)

    def bn(y, gamma, beta, eps=1e-5):
        mean = jnp.mean(y, axis=(0, 2, 3), keepdims=True)
        var = jnp.mean((y - mean) ** 2, axis=(0, 2, 3), keepdims=True)
        g = gamma.reshape(1, -1, 1, 1)
        b = beta.reshape(1, -1, 1, 1)
        return (y - mean) / jnp.sqrt(var + eps) * g + b

    y1 = conv3x3(x, dense_w(params["U1"], params["V1"]))
    h = jnp.maximum(bn(y1, params["gamma1"], params["beta1"]), 0.0)
    y2 = conv3x3(h, dense_w(params["U2"], params["V2"]))
    return jnp.maximum(bn(y2, params["gamma2"], params["beta2"]) + x, 0.0)


# ------------------------------------------------------------------
if __name__ == "__main__":
    key = jax.random.PRNGKey(0)
    k_x, k_p = jax.random.split(key)

    N, C, H, W = 2, 8, 16, 16          # in_planes = planes = 8, stride = 1
    rank = 4
    x = jax.random.normal(k_x, (N, C, H, W), jnp.float32)
    params = init_params(k_p, in_planes=C, planes=C, rank=rank, stride=1)

    out = jax.block_until_ready(basic_block_forward(x, params))
    ref = jax.block_until_ready(reference_forward(x, params))

    assert out.shape == (N, C, H, W)
    max_err = float(jnp.max(jnp.abs(out - ref)))
    assert jnp.allclose(out, ref, atol=2e-2, rtol=2e-2), max_err

    print("KERNEL_OK")
</pallas_src>

<mosaic_0001>
module attributes {stable_mosaic.version = 11 : i64} {
  func.func @kernel(%arg0: i32, %arg1: memref<1x8x512xf32, #tpu.memory_space<vmem>>, %arg2: memref<8x72xf32, #tpu.memory_space<vmem>>, %arg3: memref<1x324xf32, #tpu.memory_space<vmem>>, %arg4: memref<1x8x512xf32, #tpu.memory_space<vmem>>, %arg5: memref<1x8x1xf32, #tpu.memory_space<vmem>>, %arg6: memref<1x8x1xf32, #tpu.memory_space<vmem>>, %arg7: memref<72x324xf32, #tpu.memory_space<vmem>>) attributes {dimension_semantics = [#tpu.dimension_semantics<parallel>], iteration_bounds = array<i64: 2>, scalar_prefetch = 0 : i64, scratch_operands = 1 : i64, tpu.core_type = #tpu.core_type<tc>, window_params = [{transform_indices = @transform_0, window_bounds = array<i64: 1, 8, 512>}, {pipeline_mode = #tpu.pipeline_mode<synchronous>, transform_indices = @transform_1, window_bounds = array<i64: 8, 72>}, {pipeline_mode = #tpu.pipeline_mode<synchronous>, transform_indices = @transform_2, window_bounds = array<i64: 1, 324>}, {transform_indices = @transform_3, window_bounds = array<i64: 1, 8, 512>}, {transform_indices = @transform_4, window_bounds = array<i64: 1, 8, 1>}, {transform_indices = @transform_5, window_bounds = array<i64: 1, 8, 1>}]} {
    %c0 = arith.constant 0 : index
    %c0_0 = arith.constant 0 : index
    %c0_1 = arith.constant 0 : index
    %0 = vector.load %arg1[%c0, %c0_0, %c0_1] : memref<1x8x512xf32, #tpu.memory_space<vmem>>, vector<1x8x512xf32>
    %1 = vector.shape_cast %0 : vector<1x8x512xf32> to vector<8x512xf32>
    %2 = vector.extract_strided_slice %1 {offsets = [0, 109], sizes = [8, 324], strides = [1, 1]} : vector<8x512xf32> to vector<8x324xf32>
    %c0_2 = arith.constant 0 : index
    %c0_3 = arith.constant 0 : index
    %3 = vector.load %arg7[%c0_2, %c0_3] : memref<72x324xf32, #tpu.memory_space<vmem>>, vector<8x324xf32>
    tpu.vector_store %arg7[%c0_2, %c0_3], %2 {strides = array<i32>} : memref<72x324xf32, #tpu.memory_space<vmem>>, vector<8x324xf32>,
    %4 = vector.extract_strided_slice %1 {offsets = [0, 110], sizes = [8, 324], strides = [1, 1]} : vector<8x512xf32> to vector<8x324xf32>
    %c8 = arith.constant 8 : index
    %c0_4 = arith.constant 0 : index
    %5 = vector.load %arg7[%c8, %c0_4] : memref<72x324xf32, #tpu.memory_space<vmem>>, vector<8x324xf32>
    tpu.vector_store %arg7[%c8, %c0_4], %4 {strides = array<i32>} : memref<72x324xf32, #tpu.memory_space<vmem>>, vector<8x324xf32>,
    %6 = vector.extract_strided_slice %1 {offsets = [0, 111], sizes = [8, 324], strides = [1, 1]} : vector<8x512xf32> to vector<8x324xf32>
    %c16 = arith.constant 16 : index
    %c0_5 = arith.constant 0 : index
    %7 = vector.load %arg7[%c16, %c0_5] : memref<72x324xf32, #tpu.memory_space<vmem>>, vector<8x324xf32>
    tpu.vector_store %arg7[%c16, %c0_5], %6 {strides = array<i32>} : memref<72x324xf32, #tpu.memory_space<vmem>>, vector<8x324xf32>,
    %8 = vector.extract_strided_slice %1 {offsets = [0, 127], sizes = [8, 324], strides = [1, 1]} : vector<8x512xf32> to vector<8x324xf32>
    %c24 = arith.constant 24 : index
    %c0_6 = arith.constant 0 : index
    %9 = vector.load %arg7[%c24, %c0_6] : memref<72x324xf32, #tpu.memory_space<vmem>>, vector<8x324xf32>
    tpu.vector_store %arg7[%c24, %c0_6], %8 {strides = array<i32>} : memref<72x324xf32, #tpu.memory_space<vmem>>, vector<8x324xf32>,
    %10 = vector.extract_strided_slice %1 {offsets = [0, 128], sizes = [8, 324], strides = [1, 1]} : vector<8x512xf32> to vector<8x324xf32>
    %c32 = arith.constant 32 : index
    %c0_7 = arith.constant 0 : index
    %11 = vector.load %arg7[%c32, %c0_7] : memref<72x324xf32, #tpu.memory_space<vmem>>, vector<8x324xf32>
    tpu.vector_store %arg7[%c32, %c0_7], %10 {strides = array<i32>} : memref<72x324xf32, #tpu.memory_space<vmem>>, vector<8x324xf32>,
    %12 = vector.extract_strided_slice %1 {offsets = [0, 129], sizes = [8, 324], strides = [1, 1]} : vector<8x512xf32> to vector<8x324xf32>
    %c40 = arith.constant 40 : index
    %c0_8 = arith.constant 0 : index
    %13 = vector.load %arg7[%c40, %c0_8] : memref<72x324xf32, #tpu.memory_space<vmem>>, vector<8x324xf32>
    tpu.vector_store %arg7[%c40, %c0_8], %12 {strides = array<i32>} : memref<72x324xf32, #tpu.memory_space<vmem>>, vector<8x324xf32>,
    %14 = vector.extract_strided_slice %1 {offsets = [0, 145], sizes = [8, 324], strides = [1, 1]} : vector<8x512xf32> to vector<8x324xf32>
    %c48 = arith.constant 48 : index
    %c0_9 = arith.constant 0 : index
    %15 = vector.load %arg7[%c48, %c0_9] : memref<72x324xf32, #tpu.memory_space<vmem>>, vector<8x324xf32>
    tpu.vector_store %arg7[%c48, %c0_9], %14 {strides = array<i32>} : memref<72x324xf32, #tpu.memory_space<vmem>>, vector<8x324xf32>,
    %16 = vector.extract_strided_slice %1 {offsets = [0, 146], sizes = [8, 324], strides = [1, 1]} : vector<8x512xf32> to vector<8x324xf32>
    %c56 = arith.constant 56 : index
    %c0_10 = arith.constant 0 : index
    %17 = vector.load %arg7[%c56, %c0_10] : memref<72x324xf32, #tpu.memory_space<vmem>>, vector<8x324xf32>
    tpu.vector_store %arg7[%c56, %c0_10], %16 {strides = array<i32>} : memref<72x324xf32, #tpu.memory_space<vmem>>, vector<8x324xf32>,
    %18 = vector.extract_strided_slice %1 {offsets = [0, 147], sizes = [8, 324], strides = [1, 1]} : vector<8x512xf32> to vector<8x324xf32>
    %c64 = arith.constant 64 : index
    %c0_11 = arith.constant 0 : index
    %19 = vector.load %arg7[%c64, %c0_11] : memref<72x324xf32, #tpu.memory_space<vmem>>, vector<8x324xf32>
    tpu.vector_store %arg7[%c64, %c0_11], %18 {strides = array<i32>} : memref<72x324xf32, #tpu.memory_space<vmem>>, vector<8x324xf32>,
    %c0_12 = arith.constant 0 : index
    %c0_13 = arith.constant 0 : index
    %20 = vector.load %arg2[%c0_12, %c0_13] : memref<8x72xf32, #tpu.memory_space<vmem>>, vector<8x72xf32>
    %c0_14 = arith.constant 0 : index
    %c0_15 = arith.constant 0 : index
    %21 = vector.load %arg7[%c0_14, %c0_15] : memref<72x324xf32, #tpu.memory_space<vmem>>, vector<72x324xf32>
    %cst = arith.constant dense<0.000000e+00> : vector<8x324xf32>
    %22 = tpu.matmul %20, %21, %cst {dimension_numbers = #tpu.dot_dimension_numbers<[1], [0], [0], [1], [0, 0, 1, 1], [], []>} : vector<8x72xf32>, vector<72x324xf32>, vector<8x324xf32> -> vector<8x324xf32>
    %c0_16 = arith.constant 0 : index
    %c0_17 = arith.constant 0 : index
    %23 = vector.load %arg3[%c0_16, %c0_17] : memref<1x324xf32, #tpu.memory_space<vmem>>, vector<1x324xf32>
    %24 = vector.broadcast %23 : vector<1x324xf32> to vector<8x324xf32>
    %25 = arith.mulf %22, %24 : vector<8x324xf32>
    %cst_18 = arith.constant dense<0.000000e+00> : vector<8xf32>
    %26 = vector.multi_reduction <add>, %25, %cst_18 [1] : vector<8x324xf32> to vector<8xf32>
    %27 = vector.shape_cast %26 : vector<8xf32> to vector<8x1xf32>
    %c0_19 = arith.constant 0 : index
    %c0_20 = arith.constant 0 : index
    %c0_21 = arith.constant 0 : index
    %28 = vector.load %arg5[%c0_19, %c0_20, %c0_21] : memref<1x8x1xf32, #tpu.memory_space<vmem>>, vector<1x8x1xf32>
    %29 = vector.shape_cast %28 : vector<1x8x1xf32> to vector<8x1xf32>
    %30 = vector.shape_cast %27 : vector<8x1xf32> to vector<1x8x1xf32>
    tpu.vector_store %arg5[%c0_19, %c0_20, %c0_21], %30 {strides = array<i32>} : memref<1x8x1xf32, #tpu.memory_space<vmem>>, vector<1x8x1xf32>,
    %31 = arith.mulf %25, %25 : vector<8x324xf32>
    %cst_22 = arith.constant dense<0.000000e+00> : vector<8xf32>
    %32 = vector.multi_reduction <add>, %31, %cst_22 [1] : vector<8x324xf32> to vector<8xf32>
    %33 = vector.shape_cast %32 : vector<8xf32> to vector<8x1xf32>
    %c0_23 = arith.constant 0 : index
    %c0_24 = arith.constant 0 : index
    %c0_25 = arith.constant 0 : index
    %34 = vector.load %arg6[%c0_23, %c0_24, %c0_25] : memref<1x8x1xf32, #tpu.memory_space<vmem>>, vector<1x8x1xf32>
    %35 = vector.shape_cast %34 : vector<1x8x1xf32> to vector<8x1xf32>
    %36 = vector.shape_cast %33 : vector<8x1xf32> to vector<1x8x1xf32>
    tpu.vector_store %arg6[%c0_23, %c0_24, %c0_25], %36 {strides = array<i32>} : memref<1x8x1xf32, #tpu.memory_space<vmem>>, vector<1x8x1xf32>,
    %cst_26 = arith.constant 0.000000e+00 : f32
    %37 = vector.broadcast %cst_26 : f32 to vector<8x512xf32>
    %c0_27 = arith.constant 0 : index
    %c0_28 = arith.constant 0 : index
    %c0_29 = arith.constant 0 : index
    %38 = vector.load %arg4[%c0_27, %c0_28, %c0_29] : memref<1x8x512xf32, #tpu.memory_space<vmem>>, vector<1x8x512xf32>
    %39 = vector.shape_cast %38 : vector<1x8x512xf32> to vector<8x512xf32>
    %40 = vector.shape_cast %37 : vector<8x512xf32> to vector<1x8x512xf32>
    tpu.vector_store %arg4[%c0_27, %c0_28, %c0_29], %40 {strides = array<i32>} : memref<1x8x512xf32, #tpu.memory_space<vmem>>, vector<1x8x512xf32>,
    %c0_30 = arith.constant 0 : index
    %c0_31 = arith.constant 0 : index
    %c128 = arith.constant 128 : index
    %41 = vector.load %arg4[%c0_30, %c0_31, %c128] : memref<1x8x512xf32, #tpu.memory_space<vmem>>, vector<1x8x324xf32>
    %42 = vector.shape_cast %41 : vector<1x8x324xf32> to vector<8x324xf32>
    %43 = vector.shape_cast %25 : vector<8x324xf32> to vector<1x8x324xf32>
    tpu.vector_store %arg4[%c0_30, %c0_31, %c128], %43 {strides = array<i32>} : memref<1x8x512xf32, #tpu.memory_space<vmem>>, vector<1x8x324xf32>,
    return
  }
  func.func @transform_0(%arg0: i32) -> (i32, i32, i32) {
    %c0_i32 = arith.constant 0 : i32
    %c0_i32_0 = arith.constant 0 : i32
    %c0_i32_1 = arith.constant 0 : i32
    return %arg0, %c0_i32, %c0_i32_0 : i32, i32, i32
  }
  func.func @transform_1(%arg0: i32) -> (i32, i32) {
    %c0_i32 = arith.constant 0 : i32
    %c0_i32_0 = arith.constant 0 : i32
    %c0_i32_1 = arith.constant 0 : i32
    return %c0_i32, %c0_i32_0 : i32, i32
  }
  func.func @transform_2(%arg0: i32) -> (i32, i32) {
    %c0_i32 = arith.constant 0 : i32
    %c0_i32_0 = arith.constant 0 : i32
    %c0_i32_1 = arith.constant 0 : i32
    return %c0_i32, %c0_i32_0 : i32, i32
  }
  func.func @transform_3(%arg0: i32) -> (i32, i32, i32) {
    %c0_i32 = arith.constant 0 : i32
    %c0_i32_0 = arith.constant 0 : i32
    %c0_i32_1 = arith.constant 0 : i32
    return %arg0, %c0_i32, %c0_i32_0 : i32, i32, i32
  }
  func.func @transform_4(%arg0: i32) -> (i32, i32, i32) {
    %c0_i32 = arith.constant 0 : i32
    %c0_i32_0 = arith.constant 0 : i32
    %c0_i32_1 = arith.constant 0 : i32
    return %arg0, %c0_i32, %c0_i32_0 : i32, i32, i32
  }
  func.func @transform_5(%arg0: i32) -> (i32, i32, i32) {
    %c0_i32 = arith.constant 0 : i32
    %c0_i32_0 = arith.constant 0 : i32
    %c0_i32_1 = arith.constant 0 : i32
    return %arg0, %c0_i32, %c0_i32_0 : i32, i32, i32
  }
}

</mosaic_0001>

<bundles_post_ra>
// kernel: tpu_custom_call.1
= control target key start
LH: loop header
LB: loop body
LE: loop exit
PB: predicated region body
PF: predicated region fallthrough
CT: control target
= control target key end

     0   :  { %11 = vsyncpa [#allocation4], 0  ;;  %s1241_s0 = inlined_call_operand.hbm [shape: f32[2,8,512], index: 0, kind: input, shape index: {}]   ;;  %s1242_s1 = inlined_call_operand.hbm [shape: f32[8,72], index: 1, kind: input, shape index: {}]   ;;  %s1243_s2 = inlined_call_operand.hbm [shape: f32[1,324], index: 2, kind: input, shape index: {}]   ;;  %s1244_s3 = inlined_call_operand.hbm [shape: f32[2,8,512], index: 3, kind: output, shape index: {0}]   ;;  %s1245_s4 = inlined_call_operand.vmem [shape: f32[2,8,1], index: 4, kind: output, shape index: {1}]   ;;  %s1246_s5 = inlined_call_operand.vmem [shape: f32[2,8,1], index: 5, kind: output, shape index: {2}]  }
   0x1   :  { %13 = vsyncpa [#allocation4 + $0x1], 0 }
   0x2   :  { %14 = vsyncpa [#allocation7], 0 }
   0x3   :  { %15 = vsyncpa [#allocation5], 0 }
   0x4   :  { %17 = vsyncpa [#allocation5 + $0x1], 0  ;;  %s1034_s18 = smov 0   ;;  %s1036_s19 = smov 0  }
   0x5   :  { %s1038_s20 = smov 0   ;;  %s1040_s21 = smov 0  }
   0x6 LB: > { %s1055_s22 = sadd.s32 4294967295, %s991_s21   ;;  %s730_s23 = sadd.s32 4294967294, %s991_s21   ;;  %s991_s21 = sphi %s1040_s21, %s1256_s21   ;;  %s987_s20 = sphi %s1038_s20, %s1255_s20   ;;  %s983_s19 = sphi %s1036_s19, %s1254_s19   ;;  %s979_s18 = sphi %s1034_s18, %s1253_s18  }
   0x7   : > { %p43_p0 = scmp.ne.s32.totalorder %s983_s19, %s979_s18  ;;  %p44_p1 = scmp.eq.s32.totalorder %s1055_s22, 0 }
   0x8   : > { %p109_p2 = scmp.eq.s32.totalorder %s1055_s22, 1  ;;  %p115_p3 = scmp.eq.s32.totalorder %s730_s23, 1 }
   0x9   : > { %p1064_p4 = por %p44_p1, %p43_p0  ;;  %p731_p5 = scmp.ge.s32.totalorder %s991_s21, 1 }
   0xa   : > { %p1069_p6 = por %p115_p3, %p43_p0  ;;  %p174_p7 = scmp.lt.s32.totalorder %s991_s21, 3 }
   0xb   : > { %s186_s28 = sshll.u32 %s1242_s1, 4  ;;  %s993_s30 = smov [#allocation6]   ;;  %s187_s28 = int_to_ptr.hbm [resolvable:$true] %s186_s28 }
   0xc   : > { %p1077_p8 = pnand %p731_p5, %p174_p7  ;;  %s188_s6 = sshll.u32 %s993_s30, 4  ;;  %s189_s6 = int_to_ptr.vmem [resolvable:$true] %s188_s6 }
   0xd   : > { %s198_s9 = sshll.u32 %s1243_s2, 4  ;;  %s994_s10 = smov [#allocation8]   ;;  %s199_s9 = int_to_ptr.hbm [resolvable:$true] %s198_s9 }
   0xe   : > { %p767_p10 = pneg %p1077_p8  ;;  %s200_s11 = sshll.u32 %s994_s10, 4  ;;  %s201_s11 = int_to_ptr.vmem [resolvable:$true] %s200_s11 }
   0xf   : > { %s1090_s12 = sadd.s32 1, %s991_s21   ;;  %s30_s13 = sadd.s32 1, %s987_s20 }
  0x10   : > { %p768_p11 = pnand %p767_p10, %p44_p1  ;;  %s27_s14 = ssub.s32 %s991_s21, %s1090_s12 }
  0x11   : > { %p37_p12 = scmp.ne.s32.totalorder %s987_s20, %s983_s19  ;;  %p28_p13 = scmp.eq.s32.totalorder %s27_s14, 0 }
  0x12   : > { %770 = dma.hbm_to_vmem [thread:$0]  (!%p768_p11), %s187_s28, 128, %s189_s6, [#allocation7]  }
  0x13   : > { %773 = dma.hbm_to_vmem [thread:$0]  (!%p768_p11), %s199_s9, 48, %s201_s11, [#allocation7]  }
  0x14   : > { %p38_p0 = scmp.eq.s32.totalorder %s991_s21, 0  ;;  %p1100_p3 = por %p109_p2, %p37_p12 }
  0x15   : > { %p784_p5 = scmp.lt.s32.totalorder %s991_s21, 2  ;;  %s211_s17 = sand.u32 1, %s987_s20  }
  0x16   : > { %s1106_s16 = scalar_select %p28_p13, %s987_s20, %s30_s13  }
  0x17   : > { %p39_p7 = por %p38_p0, %p37_p12  ;;  %s735_s23 = sshll.u32 %s211_s17, 5 }
  0x18   : > { %s753_s26 = sshll.u32 %s991_s21, 5  ;;  %s215_s6 = scalar_lea.vmem [#allocation3], %s735_s23 }
  0x19   : > { %s220_s30 = scalar_lea.hbm %s1241_s0, %s753_s26  ;;  %s224_s7 = sshll.u32 %s215_s6, 4  ;;  %s225_s7 = int_to_ptr.vmem [resolvable:$true] %s224_s7 }
  0x1a   : > { %s222_s8 = sshll.u32 %s220_s30, 4  ;;  %p1113_p2 = pnand %p784_p5, %p39_p7  ;;  %s223_s8 = int_to_ptr.hbm [resolvable:$true] %s222_s8 }
  0x1b   : > { %s212_s10 = scalar_lea.sflag [#allocation4], %s211_s17  ;;  %s891_s11 = sshra.s32 %s223_s8, 4  ;;  %s892_s11 = int_to_ptr.hbm [resolvable:$true] %s891_s11 }
  0x1c   : > { %s893_s13 = scalar_lea.hbm %s892_s11, 32  ;;  %p895_p11 = pneg %p1113_p2 }
  0x1d   : > { %p894_p10 = scmp.ne.s32.totalorder %s892_s11, %s893_s13  ;;  %s898_s26 = scalar_lea.hbm %s1241_s0, 64 }
  0x1e   : > { %p899_p0 = scmp.lt.s32.totalorder %s892_s11, %s1241_s0  ;;  %p900_p5 = scmp.lt.s32.totalorder %s898_s26, %s893_s13 }
  0x1f   : > { %p896_p12 = pnand %p895_p11, %p894_p10 }
  0x20   : > { %p901_p7 = por %p900_p5, %p899_p0 }
  0x21   : > { %p897_p13 = pneg %p896_p12 }
  0x23   : > { %p902_p9 = pnand %p901_p7, %p897_p13 }
  0x25   : > { %905 = shalt.err (!%p902_p9)
}
  0x26   : > { %777 = dma.hbm_to_vmem [thread:$0]  (!%p1113_p2), %s223_s8, 512, %s225_s7, %s212_s10  }
  0x27   : > { %233 = sbr.rel (%p1077_p8) target bundleno = 488 (0x1e8), region = 32  ;;  %s1130_s17 = sand.u32 (!%p1077_p8), 1, %s983_s19  }
  0x28   : > { %s739_s30 = sshll.u32 (!%p1077_p8), %s1130_s17, 5  ;;  %s236_s6 = scalar_lea.sflag (!%p1077_p8), [#allocation4], %s1130_s17 }
  0x29   : > { %s1136_s11 = scalar_lea.vmem (!%p1077_p8), [#allocation3], %s739_s30 }
  0x2c   : > { %966 = dma.done.wait (%p1064_p4), %s236_s6, 512  }
  0x2d   : > { %968 = vsyncadd (%p1064_p4), %s236_s6, 4294966784 }
  0x2e   : > { %970 = dma.done.wait (%p44_p1), [#allocation7], 176  }
  0x2f   : > { %972 = vsyncadd (%p44_p1), [#allocation7], 4294967120  ;;  %v296_v0 = vld [vmem:[%s1136_s11 + $0x18] sm:$0xff]  ;;  %v1148_v1 = vld [vmem:[%s1136_s11 + $0x10] sm:$0xff]  ;;  %s995_s29 = smov 111   ;;  %s996_s7 = smov 109  }
  0x30   : > { %396 = vrot.lane.b32.xlu1 %v296_v0, %s995_s29  ;;  %426 = vrot.lane.b32.xlu0 %v296_v0, %s996_s7  ;;  %v1151_v2 = vld [vmem:[%s1136_s11 + $0x8] sm:$0xff]  ;;  %s997_s24 = smov 110   ;;  %s998_s8 = smov 127   ;;  %v293_v3 = vld [vmem:[%s1136_s11] sm:$0xff]  ;;  %vm318_vm0 = vcmask 556032   ;;  %vm428_vm1 = vcmask 891904  }
  0x31   : > { %424 = vrot.lane.b32.xlu2 %v1148_v1, %s996_s7  ;;  %s999_s9 = smov 1   ;;  %s1000_s10 = smov 17   ;;  %376 = vst.msk [vmem:[#allocation2 + $0x70] sm:$0xff] %vm318_vm0, %v296_v0  ;;  %vm413_vm2 = vcmask 900096   ;;  %vm398_vm3 = vcmask 908288   ;;  %vm364_vm4 = vcmask 7168  }
  0x32   : > { %s1001_s13 = smov 18   ;;  %s1002_s14 = smov 19   ;;  %vm383_vm5 = vcmask 1039360   ;;  %vm346_vm6 = vcmask 138240   ;;  %vm328_vm7 = vcmask 146432   ;;  %vm309_vm8 = vcmask 154624  }
  0x33   : > { %v437_v56 = vld [vmem:[#allocation6] sm:$0xff]  ;;  %vm465_vm9 = vcmask 588800   ;;  %s272_s23 = scalar_lea.vmem [#allocation9], %s739_s30  ;;  %v1003_v62 = vmov 0.0   ;;  %v529_v63 = vld [vmem:[#allocation8] sm:$0x7] }
  0x34   : > { %555 = vst [vmem:[%s272_s23] sm:$0xff] %v1003_v62  ;;  %s754_s26 = sshll.u32 %s1055_s22, 5  ;;  %s584_s11 = sshll.u32 %s272_s23, 4  ;;  %s585_s11 = int_to_ptr.vmem [resolvable:$true] %s584_s11 }
  0x35   : > { %558 = vst [vmem:[%s272_s23 + $0x18] sm:$0xff] %v1003_v62  ;;  %s582_s6 = scalar_lea.hbm %s1244_s3, %s754_s26  ;;  %s563_s30 = scalar_lea.sflag [#allocation5], %s1130_s17 }
  0x38   : > { %411 = vrot.lane.b32.xlu0 %v296_v0, %s997_s24  ;;  %422 = vrot.lane.b32.xlu1 %v1151_v2, %s996_s7  ;;  %v452_v24 = vld [vmem:[#allocation2 + $0x70] sm:$0xff] }
  0x39   : > { %381 = vrot.lane.b32.xlu2 %v296_v0, %s998_s8 }
  0x40   : > { %407 = vrot.lane.b32.xlu0 %v1151_v2, %s997_s24  ;;  %409 = vrot.lane.b32.xlu1 %v1148_v1, %s997_s24 }
  0x41   : > { %392 = vrot.lane.b32.xlu2 %v1151_v2, %s995_s29 }
  0x48   : > { %394 = vrot.lane.b32.xlu0 %v1148_v1, %s995_s29  ;;  %360 = vrot.lane.b32.xlu1 %v1148_v1, %s999_s9  ;;  %s586_s29 = sshll.u32 %s582_s6, 4  ;;  %s587_s29 = int_to_ptr.hbm [resolvable:$true] %s586_s29 }
  0x49   : > { %362 = vrot.lane.b32.xlu2 %v296_v0, %s999_s9  ;;  %s935_s7 = sshra.s32 %s587_s29, 4  ;;  %s936_s7 = int_to_ptr.hbm [resolvable:$true] %s935_s7 }
  0x4a   : > { %s937_s24 = scalar_lea.hbm %s936_s7, 32  ;;  %p942_p9 = scmp.lt.s32.totalorder %s936_s7, %s1244_s3 }
  0x4b   : > { %p938_p1 = scmp.ne.s32.totalorder %s936_s7, %s937_s24 }
  0x4d   : > { %p939_p4 = pnand %p938_p1, %p1100_p3 }
  0x4f   : > { %p940_p8 = pneg %p939_p4 }
  0x50   : > { %377 = vrot.lane.b32.xlu0 %v1151_v2, %s998_s8  ;;  %379 = vrot.lane.b32.xlu1 %v1148_v1, %s998_s8 }
  0x51   : > { %342 = vrot.lane.b32.xlu2 %v1148_v1, %s1000_s10 }
  0x58   : > { %344 = vrot.lane.b32.xlu0 %v296_v0, %s1000_s10  ;;  %324 = vrot.lane.b32.xlu1 %v1148_v1, %s1001_s13 }
  0x59   : > { %326 = vrot.lane.b32.xlu2 %v296_v0, %s1001_s13 }
  0x60   : > { %358 = vrot.lane.b32.xlu1 %v1151_v2, %s999_s9  ;;  %356 = vrot.lane.b32.xlu0 %v293_v3, %s999_s9 }
  0x61   : > { %305 = vrot.lane.b32.xlu2 %v1148_v1, %s1002_s14 }
  0x68   : > { %338 = vrot.lane.b32.xlu1 %v293_v3, %s1000_s10  ;;  %307 = vrot.lane.b32.xlu0 %v296_v0, %s1002_s14  ;;  %v533_v0 = vperm.slane %v529_v63, 2 }
  0x69   : > { %340 = vrot.lane.b32.xlu2 %v1151_v2, %s1000_s10  ;;  %s941_s10 = scalar_lea.hbm %s1244_s3, 64 }
  0x6a   : > { %p943_p2 = scmp.lt.s32.totalorder %s941_s10, %s937_s24 }
  0x6c   : > { %p944_p10 = por %p943_p2, %p942_p9 }
  0x6e   : > { %p945_p11 = pnand %p944_p10, %p940_p8 }
  0x70   : > { %322 = vrot.lane.b32.xlu1 %v1151_v2, %s1001_s13  ;;  %320 = vrot.lane.b32.xlu0 %v293_v3, %s1001_s13 }
  0x71   : > { %301 = vrot.lane.b32.xlu2 %v293_v3, %s1002_s14 }
  0x78   : > { %303 = vrot.lane.b32.xlu0 %v1151_v2, %s1002_s14 }
  0x8b   : > { %v425_v4 = vpop.permute.xlu2 %424 }
  0x93   : > { %v382_v5 = vpop.permute.xlu2 %381 }
  0x94   : > { %391 = vst.msk [vmem:[#allocation2 + $0x88] sm:$0xff] %vm318_vm0, %v382_v5 }
  0x9b   : > { %v393_v6 = vpop.permute.xlu2 %392  ;;  %v455_v23 = vld [vmem:[#allocation2 + $0x88] sm:$0xff] }
  0xa2   : > { %v397_v7 = vpop.permute.xlu1 %396  ;;  %v427_v8 = vpop.permute.xlu0 %426 }
  0xa3   : > { %406 = vst.msk [vmem:[#allocation2 + $0xa0] sm:$0xff] %vm318_vm0, %v397_v7  ;;  %v430_v9 = vsel %vm428_vm1, %v425_v4, %v427_v8  ;;  %v363_v10 = vpop.permute.xlu2 %362 }
  0xa4   : > { %496 = vmatpush.msra.mxu1 %v430_v9  ;;  %436 = vst.msk [vmem:[#allocation2 + $0xd0] sm:$0xff] %vm318_vm0, %v427_v8 }
  0xaa   : > { %v412_v11 = vpop.permute.xlu0 %411  ;;  %v423_v12 = vpop.permute.xlu1 %422  ;;  %v458_v22 = vld [vmem:[#allocation2 + $0xa0] sm:$0xff] }
  0xab   : > { %421 = vst.msk [vmem:[#allocation2 + $0xb8] sm:$0xff] %vm318_vm0, %v412_v11  ;;  %v429_v13 = vsel %vm428_vm1, %v423_v12, %v425_v4  ;;  %v343_v14 = vpop.permute.xlu2 %342  ;;  %v464_v15 = vld [vmem:[#allocation2 + $0xd0] sm:$0xff] }
  0xac   : > { %476 = vmatpush.msra.mxu0 %v429_v13  ;;  %516 = vmatpush.msra.mxu2 %v464_v15 }
  0xb2   : > { %v408_v16 = vpop.permute.xlu0 %407  ;;  %v410_v17 = vpop.permute.xlu1 %409  ;;  %v461_v18 = vld [vmem:[#allocation2 + $0xb8] sm:$0xff] }
  0xb3   : > { %v414_v19 = vsel %vm413_vm2, %v408_v16, %v410_v17  ;;  %v415_v20 = vsel %vm413_vm2, %v410_v17, %v412_v11  ;;  %517 = vmatpush.msra.mxu2 %v461_v18  ;;  %v327_v21 = vpop.permute.xlu2 %326 }
  0xb4   : > { %477 = vmatpush.msra.mxu0 %v414_v19  ;;  %497 = vmatpush.msra.mxu1 %v415_v20 }
  0xb5   : > { %518 = vmatpush.msra.mxu2 %v458_v22 }
  0xb7   : > { %519 = vmatpush.msra.mxu2 %v455_v23 }
  0xb9   : > { %520 = vmatpush.msra.mxu2 %v452_v24 }
  0xba   : > { %v395_v25 = vpop.permute.xlu0 %394  ;;  %v361_v26 = vpop.permute.xlu1 %360 }
  0xbb   : > { %v399_v27 = vsel %vm398_vm3, %v393_v6, %v395_v25  ;;  %v400_v28 = vsel %vm398_vm3, %v395_v25, %v397_v7  ;;  %v367_v29 = vsel %vm364_vm4, %v361_v26, %v363_v10  ;;  %v306_v30 = vpop.permute.xlu2 %305 }
  0xbc   : > { %478 = vmatpush.msra.mxu0 %v399_v27  ;;  %498 = vmatpush.msra.mxu1 %v400_v28  ;;  %373 = vst.msk [vmem:[#allocation2 + $0x58] sm:$0xff] %vm318_vm0, %v367_v29 }
  0xc2   : > { %v378_v31 = vpop.permute.xlu0 %377  ;;  %v380_v32 = vpop.permute.xlu1 %379 }
  0xc3   : > { %v384_v33 = vsel %vm383_vm5, %v378_v31, %v380_v32  ;;  %v385_v34 = vsel %vm383_vm5, %v380_v32, %v382_v5  ;;  %v341_v35 = vpop.permute.xlu2 %340  ;;  %v449_v37 = vld [vmem:[#allocation2 + $0x58] sm:$0xff] }
  0xc4   : > { %v348_v36 = vsel %vm346_vm6, %v341_v35, %v343_v14  ;;  %479 = vmatpush.msra.mxu0 %v384_v33  ;;  %499 = vmatpush.msra.mxu1 %v385_v34 }
  0xc5   : > { %521 = vmatpush.msra.mxu2 %v449_v37 }
  0xc6   : > { %480 = vmatpush.msra.mxu0 %v1151_v2  ;;  %500 = vmatpush.msra.mxu1 %v1148_v1  ;;  %v531_v1 = vperm.slane %v529_v63, 0  ;;  %v532_v2 = vperm.slane %v529_v63, 1 }
  0xca   : > { %v345_v38 = vpop.permute.xlu0 %344  ;;  %v325_v39 = vpop.permute.xlu1 %324 }
  0xcb   : > { %v349_v40 = vsel %vm346_vm6, %v343_v14, %v345_v38  ;;  %v331_v41 = vsel %vm328_vm7, %v325_v39, %v327_v21  ;;  %v302_v58 = vpop.permute.xlu2 %301 }
  0xcc   : > { %355 = vst.msk [vmem:[#allocation2 + $0x40] sm:$0xff] %vm318_vm0, %v349_v40 }
  0xcd   : > { %337 = vst.msk [vmem:[#allocation2 + $0x28] sm:$0xff] %vm318_vm0, %v331_v41 }
  0xd2   : > { %v359_v42 = vpop.permute.xlu1 %358  ;;  %v357_v43 = vpop.permute.xlu0 %356 }
  0xd3   : > { %v366_v44 = vsel %vm364_vm4, %v359_v42, %v361_v26  ;;  %v365_v45 = vsel %vm364_vm4, %v357_v43, %v359_v42  ;;  %v446_v46 = vld [vmem:[#allocation2 + $0x40] sm:$0xff] }
  0xd4   : > { %522 = vmatpush.msra.mxu2 %v446_v46  ;;  %v443_v47 = vld [vmem:[#allocation2 + $0x28] sm:$0xff]  ;;  %481 = vmatpush.msra.mxu0 %v365_v45 }
  0xd5   : > { %501 = vmatpush.msra.mxu1 %v366_v44 }
  0xd6   : > { %523 = vmatpush.msra.mxu2 %v443_v47 }
  0xd7   : > { %502 = vmatpush.msra.mxu1 %v348_v36 }
  0xda   : > { %v339_v48 = vpop.permute.xlu1 %338  ;;  %v308_v49 = vpop.permute.xlu0 %307 }
  0xdb   : > { %v347_v50 = vsel %vm346_vm6, %v339_v48, %v341_v35  ;;  %v312_v51 = vsel %vm309_vm8, %v306_v30, %v308_v49 }
  0xdc   : > { %482 = vmatpush.msra.mxu0 %v347_v50  ;;  %319 = vst.msk [vmem:[#allocation2 + $0x10] sm:$0xff] %vm318_vm0, %v312_v51 }
  0xe2   : > { %v323_v52 = vpop.permute.xlu1 %322  ;;  %v321_v53 = vpop.permute.xlu0 %320 }
  0xe3   : > { %v330_v54 = vsel %vm328_vm7, %v323_v52, %v325_v39  ;;  %v329_v55 = vsel %vm328_vm7, %v321_v53, %v323_v52  ;;  %v440_v57 = vld [vmem:[#allocation2 + $0x10] sm:$0xff] }
  0xe4   : > { %483 = vmatpush.msra.mxu0 %v329_v55  ;;  %503 = vmatpush.msra.mxu1 %v330_v54 }
  0xe5   : > { %524 = vmatpush.msra.mxu2 %v440_v57 }
  0xe6   : > { %747 = vmatmul.msk.f32.vlgmr.msra.gmra.mxu2 %vm465_vm9, %v437_v56 }
  0xea   : > { %v304_v59 = vpop.permute.xlu0 %303 }
  0xeb   : > { %v310_v60 = vsel %vm309_vm8, %v302_v58, %v304_v59  ;;  %v311_v61 = vsel %vm309_vm8, %v304_v59, %v306_v30 }
  0xec   : > { %484 = vmatpush.msra.mxu0 %v310_v60  ;;  %504 = vmatpush.msra.mxu1 %v311_v61 }
  0xed   : > { %745 = vmatmul.msk.f32.vlgmr.msra.gmra.mxu0 %vm465_vm9, %v437_v56  ;;  %746 = vmatmul.msk.f32.vlgmr.msra.gmra.mxu1 %vm465_vm9, %v437_v56 }
 0x169   : > { %v526_v3 = vpop.f32.mrf.mxu2 }
 0x16a   : > { %v486_v4 = vpop.f32.mrf.mxu0  ;;  %v506_v5 = vpop.f32.mrf.mxu1  ;;  %v539_v6 = vmul.f32 %v533_v0, %v526_v3 }
 0x16b   : > { %v537_v7 = vmul.f32 %v531_v1, %v486_v4  ;;  %v538_v8 = vmul.f32 %v532_v2, %v506_v5 }
 0x16c   : > { %561 = vst.msk [vmem:[%s272_s23 + $0x18] sm:$0xff] %vm318_vm0, %v539_v6  ;;  %v541_v9 = vsel %vm318_vm0, %v539_v6, 0.0  ;;  %v548_v10 = vmul.f32 %v539_v6, %v539_v6 }
 0x16d   : > { %v546_v11 = vmul.f32 %v537_v7, %v537_v7  ;;  %559 = vst [vmem:[%s272_s23 + $0x8] sm:$0xff] %v537_v7  ;;  %v547_v12 = vmul.f32 %v538_v8, %v538_v8  ;;  %v540_v13 = vadd.f32 %v538_v8, %v537_v7 }
 0x16e   : > { %560 = vst [vmem:[%s272_s23 + $0x10] sm:$0xff] %v538_v8  ;;  %v550_v14 = vsel %vm318_vm0, %v548_v10, 0.0 }
 0x16f   : > { %v542_v15 = vadd.f32 %v541_v9, %v540_v13  ;;  %v549_v16 = vadd.f32 %v547_v12, %v546_v11 }
 0x170   : > { %948 = shalt.err (!%p945_p11)
}
 0x171   : > { %765 = dma.vmem_to_hbm [thread:$0]  (%p1100_p3), %s585_s11, 512, %s587_s29, %s563_s30   ;;  %543 = vadd.xlane.f32.xlu1 %v542_v15  ;;  %v551_v17 = vadd.f32 %v550_v14, %v549_v16 }
 0x172   : > { %p285_p12 = scmp.lt.s32.totalorder %s1055_s22, 1 }
 0x173   : > { %552 = vadd.xlane.f32.xlu2 %v551_v17 }
 0x174   : > { %s1258_s22 = smov (!%p285_p12, %s1055_s22), 1 }
 0x175   : > { %s743_s17 = sshll.u32 %s1258_s22, 3 }
 0x176   : > { %s288_s27 = scalar_lea.vmem %s1245_s4, %s743_s17  ;;  %s292_s7 = scalar_lea.vmem %s1246_s5, %s743_s17 }
 0x1e4   : > { %v544_v18 = vpop.xlane.xlu1 %543 }
 0x1e5   : > { %545 = vst.msk [vmem:[%s288_s27] sm:$0xff] %vm364_vm4, %v544_v18 }
 0x1e6   : > { %v553_v19 = vpop.xlane.xlu2 %552 }
 0x1e7   : > { %554 = vst.msk [vmem:[%s292_s7] sm:$0xff] %vm364_vm4, %v553_v19 }
 0x1e8 PF: > { %s604_s15 = sand.u32 1, %s979_s18   ;;  %p1252_p3 = scmp.ge.s32.totalorder %s991_s21, 2 }
 0x1e9   : > { %s605_s22 = scalar_lea.sflag [#allocation5], %s604_s15 }
 0x1ea   : > { %p779_p13 = pnand %p1252_p3, %p1069_p6 }
 0x1ec   : > { %p780_p0 = pneg %p779_p13 }
 0x1ee   : > { %974 = dma.done.wait (%p780_p0), %s605_s22, 512  }
 0x1ef   : > { %976 = vsyncadd (%p780_p0), %s605_s22, 4294966784  ;;  %p20_p5 = scmp.ge.s32.totalorder %s1090_s12, 4   ;;  %s1253_s18 = smov %s983_s19 }
 0x1f0   : > { %s1254_s19 = smov %s987_s20  ;;  %s1255_s20 = smov %s1106_s16 }
 0x1f1   : > { %s1256_s21 = smov %s1090_s12  ;;  %22 = sbr.rel (!%p20_p5) target bundleno = 6 (0x6), region = 109 }
 0x1f6   :  { %625 = vsyncpa [#allocation4], 1 }
 0x1f7   :  { %627 = vsyncpa [#allocation4 + $0x1], 1 }
 0x1f8   :  { %628 = vsyncpa [#allocation7], 1 }
 0x1f9   :  { %629 = vsyncpa [#allocation5], 1 }
 0x1fa   :  { %631 = vsyncpa [#allocation5 + $0x1], 1 }

</bundles_post_ra>
